<compile_context>
chip_gen: v7x
topology: tpu7x:2x2x1
jax: 0.10.0
libtpu: 0.0.40
codegen_flags: <defaults>
</compile_context>

<pallas_src>
import functools
import math

import jax
import jax.numpy as jnp
from jax.experimental import pallas as pl
from jax.experimental.pallas import tpu as pltpu

LANE = 128  # vreg lane width


def _round_up(x, m):
    return ((x + m - 1) // m) * m


def _pad2(a, rows, cols, dtype=None):
    if dtype is not None:
        a = a.astype(dtype)
    return jnp.pad(a, ((0, rows - a.shape[0]), (0, cols - a.shape[1])))


# --------------------------------------------------------------------------- #
# Kernel
# --------------------------------------------------------------------------- #
def decoder_kernel(z_ref, w1_ref, b1_ref, w2_ref, b2_ref, w3_ref, b3_ref, out_ref):
    """One (tm, z_dim) batch tile: Linear+ReLU -> Linear+ReLU -> Linear+Sigmoid."""
    cdt = w1_ref.dtype  # MXU operand dtype (bf16 or f32); accumulation is f32

    # Layer 1: z (tm, z_dim) @ W1 (z_dim, hp).  z_dim is tiny; Mosaic pads the
    # contraction dim in-register, so z needs no HBM-level lane padding.
    h = jnp.dot(z_ref[...], w1_ref[...], preferred_element_type=jnp.float32)
    h = jnp.maximum(h + b1_ref[...], 0.0)          # bias + ReLU in f32 (VPU)

    # Layer 2 (FCLayer with ReLU).
    h = jnp.dot(h.astype(cdt), w2_ref[...], preferred_element_type=jnp.float32)
    h = jnp.maximum(h + b2_ref[...], 0.0)

    # Output layer (N = inp_dim, unpadded) + sigmoid via tanh: one EUP push per
    # element, exact to f32 rounding.
    logits = jnp.dot(h.astype(cdt), w3_ref[...], preferred_element_type=jnp.float32)
    logits = logits + b3_ref[...]
    out_ref[...] = 0.5 * (jnp.tanh(0.5 * logits) + 1.0)


# --------------------------------------------------------------------------- #
# Parameter preparation (hoisted off the per-call path)
# --------------------------------------------------------------------------- #
def prepare_decoder_params(w1, b1, w2, b2, w3, b3, *, compute_dtype=jnp.bfloat16):
    """Pad/cast the weights once at model-load time.

    Only the hidden dimension is padded to 128 lanes (the intermediate h lives
    in VMEM only); z_dim and inp_dim stay unpadded so the per-row pipelined
    HBM traffic is exactly what the model needs.  Hidden-dim zero-padding is
    exact: padded h columns are relu(0)=0 and the matching W2/W3 rows are 0.
    """
    z_dim, hid_dim = w1.shape
    inp_dim = w3.shape[1]
    hp = _round_up(hid_dim, LANE)
    return dict(
        w1=_pad2(w1, z_dim, hp, compute_dtype),
        b1=_pad2(b1.reshape(1, -1), 1, hp, jnp.float32),
        w2=_pad2(w2, hp, hp, compute_dtype),
        b2=_pad2(b2.reshape(1, -1), 1, hp, jnp.float32),
        w3=_pad2(w3, hp, inp_dim, compute_dtype),
        b3=b3.reshape(1, -1).astype(jnp.float32),
    )


# --------------------------------------------------------------------------- #
# Forward
# --------------------------------------------------------------------------- #
@functools.partial(jax.jit, static_argnames=("max_rows_per_tile",))
def decoder_forward(z, params, *, max_rows_per_tile=2048):
    batch, z_dim = z.shape
    w1, b1 = params["w1"], params["b1"]
    w2, b2 = params["w2"], params["b2"]
    w3, b3 = params["w3"], params["b3"]
    hp = w1.shape[1]
    inp_dim = w3.shape[1]
    compute_dtype = w1.dtype
    bpe = jnp.dtype(compute_dtype).itemsize

    # ---- batch tiling ------------------------------------------------------
    # Tile rows are a multiple of the dtype's sublane tile (16 for bf16, 8 for
    # f32).  Aim for an even number of grid steps (>=2 when batch permits) so
    # v7x's second TensorCore gets work and z/out DMAs pipeline behind compute.
    row_mult = 16 if bpe == 2 else 8
    batch_rows = _round_up(batch, row_mult)
    steps = max(2, pl.cdiv(batch_rows, max_rows_per_tile))
    steps += steps % 2                                     # even step count
    tm = max(row_mult, _round_up(pl.cdiv(batch_rows, steps), row_mult))
    steps = pl.cdiv(batch_rows, tm)
    batch_pad = steps * tm

    z_in = z.astype(compute_dtype)
    if batch_pad != batch:
        z_in = jnp.pad(z_in, ((0, batch_pad - batch), (0, 0)))

    # ---- VMEM budget (scoped-limit aware, double-buffering accounted) -------
    weight_bytes = (w1.size + w2.size + w3.size) * bpe \
                   + (b1.size + b2.size + b3.size) * 4
    tile_io_bytes = 2 * tm * (z_dim * bpe + inp_dim * 4)        # 2x: double buffers
    interm_bytes = tm * (2 * hp * 4 + hp * bpe + 2 * inp_dim * 4)
    vmem_limit = int(min(max(weight_bytes + tile_io_bytes + interm_bytes + (4 << 20),
                             16 << 20),
                         48 << 20))                              # safe on v5e/v6e/v7x

    # ---- cost estimate from actual (unpadded-IO) work -----------------------
    cost = pl.CostEstimate(
        flops=2 * batch_pad * (z_dim * hp + hp * hp + hp * inp_dim),
        transcendentals=batch_pad * inp_dim,                     # one tanh / element
        bytes_accessed=int(z_in.nbytes + weight_bytes + batch_pad * inp_dim * 4),
    )

    resident = lambda shape: pl.BlockSpec(shape, lambda i: (0, 0))
    grid_spec = pltpu.PrefetchScalarGridSpec(
        num_scalar_prefetch=0,
        grid=(steps,),
        in_specs=[
            pl.BlockSpec((tm, z_dim), lambda i: (i, 0)),  # pipelined batch tile
            resident((z_dim, hp)), resident((1, hp)),     # W1, b1 (fetched once)
            resident((hp, hp)), resident((1, hp)),        # W2, b2
            resident((hp, inp_dim)), resident((1, inp_dim)),  # W3, b3
        ],
        out_specs=pl.BlockSpec((tm, inp_dim), lambda i: (i, 0)),  # unpadded lanes
    )

    out = pl.pallas_call(
        decoder_kernel,
        out_shape=jax.ShapeDtypeStruct((batch_pad, inp_dim), jnp.float32),
        grid_spec=grid_spec,
        compiler_params=pltpu.CompilerParams(
            dimension_semantics=("parallel",),   # batch tiles shard across TCs
            vmem_limit_bytes=vmem_limit,
        ),
        cost_estimate=cost,
    )(z_in, w1, b1, w2, b2, w3, b3)

    return out if batch_pad == batch else out[:batch]


# --------------------------------------------------------------------------- #
# Reference + init helpers
# --------------------------------------------------------------------------- #
def init_linear(key, fan_in, fan_out):
    # Mimic PyTorch nn.Linear default init: U(-1/sqrt(fan_in), 1/sqrt(fan_in)).
    kw, kb = jax.random.split(key)
    bound = 1.0 / math.sqrt(fan_in)
    w = jax.random.uniform(kw, (fan_in, fan_out), jnp.float32, -bound, bound)
    b = jax.random.uniform(kb, (1, fan_out), jnp.float32, -bound, bound)
    return w, b


def reference_forward(z, w1, b1, w2, b2, w3, b3):
    h = jax.nn.relu(z @ w1 + b1)
    h = jax.nn.relu(h @ w2 + b2)
    return jax.nn.sigmoid(h @ w3 + b3)


if __name__ == "__main__":
    # Decoder(inp_dim=64, hid_dim=32, z_dim=16, num_hidden=1); batch of 8 codes.
    batch, z_dim, hid_dim, inp_dim = 8, 16, 32, 64

    key = jax.random.PRNGKey(0)
    kz, k1, k2, k3 = jax.random.split(key, 4)

    z = jax.random.normal(kz, (batch, z_dim), jnp.float32)
    w1, b1 = init_linear(k1, z_dim, hid_dim)    # from_z_to_hidden
    w2, b2 = init_linear(k2, hid_dim, hid_dim)  # hiddens.fc1
    w3, b3 = init_linear(k3, hid_dim, inp_dim)  # hidden_to_input

    ref = reference_forward(z, w1, b1, w2, b2, w3, b3)

    # f32-operand path: exact sigmoid (tanh form), matches the f32 reference.
    params_f32 = prepare_decoder_params(w1, b1, w2, b2, w3, b3,
                                        compute_dtype=jnp.float32)
    out_f32 = jax.block_until_ready(decoder_forward(z, params_f32))
    assert out_f32.shape == (batch, inp_dim)
    assert jnp.allclose(out_f32, ref, atol=1e-4, rtol=1e-4), "f32 mismatch vs reference"

    # Default bf16-operand path (f32 accumulation): half the HBM traffic;
    # differences vs the f32 reference are bf16 operand quantization only.
    params_bf16 = prepare_decoder_params(w1, b1, w2, b2, w3, b3)
    out_bf16 = jax.block_until_ready(decoder_forward(z, params_bf16))
    assert out_bf16.shape == (batch, inp_dim)
    assert jnp.allclose(out_bf16, ref, atol=3e-2, rtol=3e-2), "bf16 mismatch vs reference"

    print("KERNEL_OK")
</pallas_src>

<mosaic_0001>
module attributes {stable_mosaic.version = 11 : i64} {
  func.func @decoder_kernel(%arg0: i32, %arg1: memref<8x16xf32, #tpu.memory_space<vmem>>, %arg2: memref<16x128xf32, #tpu.memory_space<vmem>>, %arg3: memref<1x128xf32, #tpu.memory_space<vmem>>, %arg4: memref<128x128xf32, #tpu.memory_space<vmem>>, %arg5: memref<1x128xf32, #tpu.memory_space<vmem>>, %arg6: memref<128x64xf32, #tpu.memory_space<vmem>>, %arg7: memref<1x64xf32, #tpu.memory_space<vmem>>, %arg8: memref<8x64xf32, #tpu.memory_space<vmem>>) attributes {dimension_semantics = [#tpu.dimension_semantics<parallel>], iteration_bounds = array<i64: 1>, scalar_prefetch = 0 : i64, scratch_operands = 0 : i64, tpu.core_type = #tpu.core_type<tc>, window_params = [{transform_indices = @transform_0, window_bounds = array<i64: 8, 16>}, {pipeline_mode = #tpu.pipeline_mode<synchronous>, transform_indices = @transform_1, window_bounds = array<i64: 16, 128>}, {pipeline_mode = #tpu.pipeline_mode<synchronous>, transform_indices = @transform_2, window_bounds = array<i64: 1, 128>}, {pipeline_mode = #tpu.pipeline_mode<synchronous>, transform_indices = @transform_3, window_bounds = array<i64: 128, 128>}, {pipeline_mode = #tpu.pipeline_mode<synchronous>, transform_indices = @transform_4, window_bounds = array<i64: 1, 128>}, {pipeline_mode = #tpu.pipeline_mode<synchronous>, transform_indices = @transform_5, window_bounds = array<i64: 128, 64>}, {pipeline_mode = #tpu.pipeline_mode<synchronous>, transform_indices = @transform_6, window_bounds = array<i64: 1, 64>}, {transform_indices = @transform_7, window_bounds = array<i64: 8, 64>}]} {
    %c0 = arith.constant 0 : index
    %c0_0 = arith.constant 0 : index
    %0 = vector.load %arg1[%c0, %c0_0] : memref<8x16xf32, #tpu.memory_space<vmem>>, vector<8x16xf32>
    %c0_1 = arith.constant 0 : index
    %c0_2 = arith.constant 0 : index
    %1 = vector.load %arg2[%c0_1, %c0_2] : memref<16x128xf32, #tpu.memory_space<vmem>>, vector<16x128xf32>
    %cst = arith.constant dense<0.000000e+00> : vector<8x128xf32>
    %2 = tpu.matmul %0, %1, %cst {dimension_numbers = #tpu.dot_dimension_numbers<[1], [0], [0], [1], [0, 0, 1, 1], [], []>} : vector<8x16xf32>, vector<16x128xf32>, vector<8x128xf32> -> vector<8x128xf32>
    %c0_3 = arith.constant 0 : index
    %c0_4 = arith.constant 0 : index
    %3 = vector.load %arg3[%c0_3, %c0_4] : memref<1x128xf32, #tpu.memory_space<vmem>>, vector<1x128xf32>
    %4 = vector.broadcast %3 : vector<1x128xf32> to vector<8x128xf32>
    %5 = arith.addf %2, %4 : vector<8x128xf32>
    %cst_5 = arith.constant 0.000000e+00 : f32
    %6 = vector.broadcast %cst_5 : f32 to vector<8x128xf32>
    %7 = arith.maximumf %5, %6 : vector<8x128xf32>
    %c0_6 = arith.constant 0 : index
    %c0_7 = arith.constant 0 : index
    %8 = vector.load %arg4[%c0_6, %c0_7] : memref<128x128xf32, #tpu.memory_space<vmem>>, vector<128x128xf32>
    %cst_8 = arith.constant dense<0.000000e+00> : vector<8x128xf32>
    %9 = tpu.matmul %7, %8, %cst_8 {dimension_numbers = #tpu.dot_dimension_numbers<[1], [0], [0], [1], [0, 0, 1, 1], [], []>} : vector<8x128xf32>, vector<128x128xf32>, vector<8x128xf32> -> vector<8x128xf32>
    %c0_9 = arith.constant 0 : index
    %c0_10 = arith.constant 0 : index
    %10 = vector.load %arg5[%c0_9, %c0_10] : memref<1x128xf32, #tpu.memory_space<vmem>>, vector<1x128xf32>
    %11 = vector.broadcast %10 : vector<1x128xf32> to vector<8x128xf32>
    %12 = arith.addf %9, %11 : vector<8x128xf32>
    %cst_11 = arith.constant 0.000000e+00 : f32
    %13 = vector.broadcast %cst_11 : f32 to vector<8x128xf32>
    %14 = arith.maximumf %12, %13 : vector<8x128xf32>
    %c0_12 = arith.constant 0 : index
    %c0_13 = arith.constant 0 : index
    %15 = vector.load %arg6[%c0_12, %c0_13] : memref<128x64xf32, #tpu.memory_space<vmem>>, vector<128x64xf32>
    %cst_14 = arith.constant dense<0.000000e+00> : vector<8x64xf32>
    %16 = tpu.matmul %14, %15, %cst_14 {dimension_numbers = #tpu.dot_dimension_numbers<[1], [0], [0], [1], [0, 0, 1, 1], [], []>} : vector<8x128xf32>, vector<128x64xf32>, vector<8x64xf32> -> vector<8x64xf32>
    %c0_15 = arith.constant 0 : index
    %c0_16 = arith.constant 0 : index
    %17 = vector.load %arg7[%c0_15, %c0_16] : memref<1x64xf32, #tpu.memory_space<vmem>>, vector<1x64xf32>
    %18 = vector.broadcast %17 : vector<1x64xf32> to vector<8x64xf32>
    %19 = arith.addf %16, %18 : vector<8x64xf32>
    %cst_17 = arith.constant 5.000000e-01 : f32
    %20 = vector.broadcast %cst_17 : f32 to vector<8x64xf32>
    %21 = arith.mulf %20, %19 : vector<8x64xf32>
    %22 = math.tanh %21 : vector<8x64xf32>
    %cst_18 = arith.constant 1.000000e+00 : f32
    %23 = vector.broadcast %cst_18 : f32 to vector<8x64xf32>
    %24 = arith.addf %22, %23 : vector<8x64xf32>
    %cst_19 = arith.constant 5.000000e-01 : f32
    %25 = vector.broadcast %cst_19 : f32 to vector<8x64xf32>
    %26 = arith.mulf %25, %24 : vector<8x64xf32>
    %c0_20 = arith.constant 0 : index
    %c0_21 = arith.constant 0 : index
    %27 = vector.load %arg8[%c0_20, %c0_21] : memref<8x64xf32, #tpu.memory_space<vmem>>, vector<8x64xf32>
    tpu.vector_store %arg8[%c0_20, %c0_21], %26 {strides = array<i32>} : memref<8x64xf32, #tpu.memory_space<vmem>>, vector<8x64xf32>,
    return
  }
  func.func @transform_0(%arg0: i32) -> (i32, i32) {
    %c0_i32 = arith.constant 0 : i32
    %c0_i32_0 = arith.constant 0 : i32
    return %arg0, %c0_i32 : i32, i32
  }
  func.func @transform_1(%arg0: i32) -> (i32, i32) {
    %c0_i32 = arith.constant 0 : i32
    %c0_i32_0 = arith.constant 0 : i32
    %c0_i32_1 = arith.constant 0 : i32
    return %c0_i32, %c0_i32_0 : i32, i32
  }
  func.func @transform_2(%arg0: i32) -> (i32, i32) {
    %c0_i32 = arith.constant 0 : i32
    %c0_i32_0 = arith.constant 0 : i32
    %c0_i32_1 = arith.constant 0 : i32
    return %c0_i32, %c0_i32_0 : i32, i32
  }
  func.func @transform_3(%arg0: i32) -> (i32, i32) {
    %c0_i32 = arith.constant 0 : i32
    %c0_i32_0 = arith.constant 0 : i32
    %c0_i32_1 = arith.constant 0 : i32
    return %c0_i32, %c0_i32_0 : i32, i32
  }
  func.func @transform_4(%arg0: i32) -> (i32, i32) {
    %c0_i32 = arith.constant 0 : i32
    %c0_i32_0 = arith.constant 0 : i32
    %c0_i32_1 = arith.constant 0 : i32
    return %c0_i32, %c0_i32_0 : i32, i32
  }
  func.func @transform_5(%arg0: i32) -> (i32, i32) {
    %c0_i32 = arith.constant 0 : i32
    %c0_i32_0 = arith.constant 0 : i32
    %c0_i32_1 = arith.constant 0 : i32
    return %c0_i32, %c0_i32_0 : i32, i32
  }
  func.func @transform_6(%arg0: i32) -> (i32, i32) {
    %c0_i32 = arith.constant 0 : i32
    %c0_i32_0 = arith.constant 0 : i32
    %c0_i32_1 = arith.constant 0 : i32
    return %c0_i32, %c0_i32_0 : i32, i32
  }
  func.func @transform_7(%arg0: i32) -> (i32, i32) {
    %c0_i32 = arith.constant 0 : i32
    %c0_i32_0 = arith.constant 0 : i32
    return %arg0, %c0_i32 : i32, i32
  }
}

</mosaic_0001>

<bundles_post_ra>
// kernel: decoder_forward.1
= control target key start
LH: loop header
LB: loop body
LE: loop exit
PB: predicated region body
PF: predicated region fallthrough
CT: control target
= control target key end

     0   :  { %v518_v2 = vmov 0.0|0.0   ;;  %vm519_vm0 = vmmov 0   ;;  %v520_v4 = vmov 0.0   ;;  %vm37_vm1 = vcmask 130048   ;;  %s708_s0 = inlined_call_operand.vmem [shape: f32[8,16], index: 0, kind: input, shape index: {}]   ;;  %s709_s1 = inlined_call_operand.vmem [shape: f32[16,128], index: 1, kind: input, shape index: {}]   ;;  %s710_s2 = inlined_call_operand.vmem [shape: f32[1,128], index: 2, kind: input, shape index: {}]   ;;  %s711_s3 = inlined_call_operand.vmem [shape: f32[128,128], index: 3, kind: input, shape index: {}]   ;;  %s712_s4 = inlined_call_operand.vmem [shape: f32[1,128], index: 4, kind: input, shape index: {}]   ;;  %s713_s5 = inlined_call_operand.vmem [shape: f32[128,64], index: 5, kind: input, shape index: {}]   ;;  %s714_s6 = inlined_call_operand.vmem [shape: f32[1,64], index: 6, kind: input, shape index: {}]   ;;  %s715_s7 = inlined_call_operand.hbm [shape: f32[8,64], index: 7, kind: output, shape index: {}]  }
   0x1   :  { %v28_v0 = vld [vmem:[%s709_s1] sm:$0xff]  ;;  %v29_v1 = vld [vmem:[%s709_s1 + $0x8] sm:$0xff]  ;;  %437 = vmatprep.subr.bf16.mxu0 %v518_v2  ;;  %364 = vmatprep.mubr.msk.f32.mxu0 %vm519_vm0, %v520_v4  ;;  %v114_v7 = vld [vmem:[%s711_s3 + $0x10] sm:$0xff] }
   0x2   :  { %v438_v3 = vpack.c.bf16 %v29_v1, %v28_v0  ;;  %v112_v5 = vld [vmem:[%s711_s3] sm:$0xff]  ;;  %v113_v6 = vld [vmem:[%s711_s3 + $0x8] sm:$0xff]  ;;  %440 = vmatprep.subr.bf16.mxu1 %v518_v2  ;;  %v115_v9 = vld [vmem:[%s711_s3 + $0x18] sm:$0xff]  ;;  %399 = vmatprep.mubr.msk.f32.mxu1 %vm519_vm0, %v520_v4 }
   0x3   :  { %v441_v8 = vpack.c.bf16 %v113_v6, %v112_v5  ;;  %v27_v10 = vld [vmem:[%s708_s0] sm:$0xff]  ;;  %v444_v11 = vpack.c.bf16 %v115_v9, %v114_v7  ;;  %v117_v13 = vld [vmem:[%s711_s3 + $0x28] sm:$0xff] }
   0x4   :  { %439 = vmatpush3.bf16.msra.mxu0 %v438_v3  ;;  %v116_v12 = vld [vmem:[%s711_s3 + $0x20] sm:$0xff] }
   0x5   :  { %442 = vmatpush3.bf16.msra.mxu1 %v441_v8  ;;  %464 = vmatprep.subr.bf16.mxu0 %v518_v2 }
   0x6   :  { %443 = vmatprep.subr.bf16.mxu1 %v518_v2 }
   0x7   :  { %365 = vmatmul.mubr.msk.f32.vlgmr.msra.gmra.mrb[0].mxu0 %vm37_vm1, %v27_v10 }
   0x8   :  { %12 = vsyncpa [#allocation3], 0  ;;  %434 = vmatprep.mubr.msk.f32.mxu0 %vm519_vm0, %v520_v4  ;;  %v447_v14 = vpack.c.bf16 %v117_v13, %v116_v12  ;;  %v118_v15 = vld [vmem:[%s711_s3 + $0x30] sm:$0xff]  ;;  %v119_v16 = vld [vmem:[%s711_s3 + $0x38] sm:$0xff]  ;;  %vm303_vm2 = vcmask 523264  }
   0x9   :  { %445 = vmatpush3.bf16.msra.mxu1 %v444_v11  ;;  %v450_v17 = vpack.c.bf16 %v119_v16, %v118_v15  ;;  %v120_v18 = vld [vmem:[%s711_s3 + $0x40] sm:$0xff]  ;;  %v121_v19 = vld [vmem:[%s711_s3 + $0x48] sm:$0xff]  ;;  %v122_v21 = vld [vmem:[%s711_s3 + $0x50] sm:$0xff] }
   0xa   :  { %446 = vmatprep.subr.bf16.mxu1 %v518_v2  ;;  %v453_v20 = vpack.c.bf16 %v121_v19, %v120_v18  ;;  %v123_v22 = vld [vmem:[%s711_s3 + $0x58] sm:$0xff]  ;;  %v124_v24 = vld [vmem:[%s711_s3 + $0x60] sm:$0xff]  ;;  %v125_v25 = vld [vmem:[%s711_s3 + $0x68] sm:$0xff] }
   0xb   :  { %v456_v23 = vpack.c.bf16 %v123_v22, %v122_v21  ;;  %v459_v26 = vpack.c.bf16 %v125_v25, %v124_v24  ;;  %v126_v27 = vld [vmem:[%s711_s3 + $0x70] sm:$0xff]  ;;  %v127_v28 = vld [vmem:[%s711_s3 + $0x78] sm:$0xff]  ;;  %v206_v30 = vld [vmem:[%s713_s5] sm:$0xff] }
   0xc   :  { %v462_v29 = vpack.c.bf16 %v127_v28, %v126_v27  ;;  %v207_v31 = vld [vmem:[%s713_s5 + $0x8] sm:$0xff]  ;;  %v208_v32 = vld [vmem:[%s713_s5 + $0x10] sm:$0xff]  ;;  %v209_v34 = vld [vmem:[%s713_s5 + $0x18] sm:$0xff] }
   0xd   :  { %448 = vmatpush3.bf16.msra.mxu1 %v447_v14  ;;  %v465_v33 = vpack.c.bf16 %v207_v31, %v206_v30  ;;  %v468_v35 = vpack.c.bf16 %v209_v34, %v208_v32  ;;  %v210_v36 = vld [vmem:[%s713_s5 + $0x20] sm:$0xff]  ;;  %v211_v37 = vld [vmem:[%s713_s5 + $0x28] sm:$0xff]  ;;  %v212_v39 = vld [vmem:[%s713_s5 + $0x30] sm:$0xff] }
   0xe   :  { %449 = vmatprep.subr.bf16.mxu1 %v518_v2  ;;  %v471_v38 = vpack.c.bf16 %v211_v37, %v210_v36  ;;  %v213_v40 = vld [vmem:[%s713_s5 + $0x38] sm:$0xff]  ;;  %v214_v42 = vld [vmem:[%s713_s5 + $0x40] sm:$0xff]  ;;  %v215_v43 = vld [vmem:[%s713_s5 + $0x48] sm:$0xff] }
   0xf   :  { %466 = vmatpush3.bf16.msra.mxu0 %v465_v33  ;;  %v474_v41 = vpack.c.bf16 %v213_v40, %v212_v39  ;;  %v477_v44 = vpack.c.bf16 %v215_v43, %v214_v42  ;;  %v216_v45 = vld [vmem:[%s713_s5 + $0x50] sm:$0xff]  ;;  %v217_v46 = vld [vmem:[%s713_s5 + $0x58] sm:$0xff]  ;;  %v218_v48 = vld [vmem:[%s713_s5 + $0x60] sm:$0xff] }
  0x10   :  { %467 = vmatprep.subr.bf16.mxu0 %v518_v2  ;;  %v480_v47 = vpack.c.bf16 %v217_v46, %v216_v45  ;;  %v219_v49 = vld [vmem:[%s713_s5 + $0x68] sm:$0xff]  ;;  %v319_v51 = vld [vmem:[%s710_s2] ss:$0 sm:$0xff]  ;;  %v220_v56 = vld [vmem:[%s713_s5 + $0x70] sm:$0xff] }
  0x11   :  { %451 = vmatpush3.bf16.msra.mxu1 %v450_v17  ;;  %v483_v50 = vpack.c.bf16 %v219_v49, %v218_v48  ;;  %v221_v57 = vld [vmem:[%s713_s5 + $0x78] sm:$0xff]  ;;  %v321_v59 = vld [vmem:[%s712_s4] ss:$0 sm:$0xff]  ;;  %s521_s5 = smov [#allocation2]  }
  0x12   :  { %452 = vmatprep.subr.bf16.mxu1 %v518_v2  ;;  %v486_v58 = vpack.c.bf16 %v221_v57, %v220_v56  ;;  %v322_v0 = vld [vmem:[%s714_s6] ss:$0 sm:$0xff]  ;;  %s311_s22 = sshll.u32 %s521_s5, 4  ;;  %s312_s22 = int_to_ptr.vmem [resolvable:$true] %s311_s22 }
  0x13   :  { %469 = vmatpush3.bf16.msra.mxu0 %v468_v35  ;;  %s494_s4 = scalar_lea.vmem %s312_s22, 128  ;;  %p499_p1 = scmp.lt.s32.totalorder %s312_s22, %s312_s22 }
  0x14   :  { %470 = vmatprep.subr.bf16.mxu0 %v518_v2  ;;  %p495_p0 = scmp.ne.s32.totalorder %s312_s22, %s494_s4  ;;  %p500_p2 = scmp.lt.s32.totalorder %s494_s4, %s494_s4 }
  0x15   :  { %454 = vmatpush3.bf16.msra.mxu1 %v453_v20 }
  0x16   :  { %455 = vmatprep.subr.bf16.mxu1 %v518_v2  ;;  %p501_p3 = por %p500_p2, %p499_p1 }
  0x17   :  { %472 = vmatpush3.bf16.msra.mxu0 %v471_v38 }
  0x18   :  { %473 = vmatprep.subr.bf16.mxu0 %v518_v2  ;;  %p502_p4 = pnand %p501_p3, %p495_p0 }
  0x19   :  { %457 = vmatpush3.bf16.msra.mxu1 %v456_v23 }
  0x1a   :  { %458 = vmatprep.subr.bf16.mxu1 %v518_v2 }
  0x1b   :  { %475 = vmatpush3.bf16.msra.mxu0 %v474_v41 }
  0x1c   :  { %476 = vmatprep.subr.bf16.mxu0 %v518_v2 }
  0x1d   :  { %460 = vmatpush3.bf16.msra.mxu1 %v459_v26 }
  0x1e   :  { %461 = vmatprep.subr.bf16.mxu1 %v518_v2 }
  0x1f   :  { %478 = vmatpush3.bf16.msra.mxu0 %v477_v44 }
  0x20   :  { %479 = vmatprep.subr.bf16.mxu0 %v518_v2 }
  0x21   :  { %463 = vmatpush3.bf16.msra.mxu1 %v462_v29 }
  0x23   :  { %481 = vmatpush3.bf16.msra.mxu0 %v480_v47 }
  0x24   :  { %482 = vmatprep.subr.bf16.mxu0 %v518_v2 }
  0x27   :  { %484 = vmatpush3.bf16.msra.mxu0 %v483_v50 }
  0x28   :  { %485 = vmatprep.subr.bf16.mxu0 %v518_v2 }
  0x2b   :  { %487 = vmatpush3.bf16.msra.mxu0 %v486_v58 }
  0xda   :  { %v107_v52 = vpop.f32.mrb[0].mxu0 }
  0xdb   :  { %v108_v53 = vadd.f32 %v319_v51, %v107_v52  ;;  %v366_v54 = vpop.f32.mrb[1].mxu0 }
  0xdd   :  { %v111_v55 = vmax.f32 %v108_v53, 0.0 }
  0xdf   :  { %400 = vmatmul.mubr.f32.vlgmr.msra.gmra.mrb[0].mxu1 %v111_v55 }
 0x1b2   :  { %v201_v60 = vpop.f32.mrb[0].mxu1 }
 0x1b3   :  { %v202_v61 = vadd.f32 %v321_v59, %v201_v60  ;;  %v401_v62 = vpop.f32.mrb[1].mxu1 }
 0x1b5   :  { %v205_v63 = vmax.f32 %v202_v61, 0.0 }
 0x1b7   :  { %435 = vmatmul.mubr.f32.vlgmr.msra.gmra.mrb[2].mxu0 %v205_v63 }
 0x28a   :  { %v295_v1 = vpop.f32.mrb[2].mxu0 }
 0x28b   :  { %v296_v2 = vadd.f32 %v322_v0, %v295_v1  ;;  %v436_v3 = vpop.f32.mrb[3].mxu0 }
 0x28d   :  { %v299_v4 = vmul.f32 0.5, %v296_v2 }
 0x28f   :  { %492 = vtanh.f32 %v299_v4 }
 0x299   :  { %v493_v5 = vpop.eup %492 }
 0x29a   :  { %v301_v6 = vadd.f32 1.0, %v493_v5 }
 0x29c   :  { %v302_v7 = vmul.f32 0.5, %v301_v6 }
 0x29e   :  { %304 = vst.msk [vmem:[#allocation2] sm:$0xff] %vm303_vm2, %v302_v7 }
 0x29f   :  { %505 = shalt.err (!%p502_p4)
}
 0x2a0   :  { %s506_s24 = scalar_lea.hbm %s715_s7, 128 }
 0x2a1   :  { %p507_p5 = scmp.ne.s32.totalorder %s715_s7, %s506_s24  ;;  %p510_p6 = scmp.lt.u32.totalorder %s506_s24, %s715_s7 }
 0x2a3   :  { %p512_p7 = pnand %p510_p6, %p507_p5 }
 0x2a5   :  { %515 = shalt.err (!%p512_p7)
}
 0x2a6   :  { %314 = dma.vmem_to_hbm [thread:$0]  %s312_s22, 128, %s715_s7, [#allocation3]  }
 0x2a7   :  { %516 = dma.done.wait [#allocation3], 128  }
 0x2a8   :  { %517 = vsyncadd [#allocation3], 4294967168 }
 0x2a9   :  { %318 = vsyncpa [#allocation3], 1 }

</bundles_post_ra>
